<compile_context>
chip_gen: v7x
topology: tpu7x:2x2x1
jax: 0.10.0
libtpu: 0.0.40
codegen_flags: <defaults>
</compile_context>

<pallas_src>
import jax
import jax.numpy as jnp
from jax.experimental import pallas as pl
from jax.experimental.pallas import tpu as pltpu

SELU_ALPHA = 1.6732632423543772848170429916717
SELU_SCALE = 1.0507009873554804934193349852946

_VMEM_LIMIT_BYTES = 48 * 1024 * 1024  # > 16/32 MiB defaults, < 64 MiB v7x physical


def _selu(x):
    # exp goes to the EUP slot; select/scale on the VPU (all f32).
    return SELU_SCALE * jnp.where(x > 0, x, SELU_ALPHA * (jnp.exp(x) - 1.0))


def _efconv_kernel(h_all_ref, h_i_ref, e_ref, nm_ref, em_ref,
                   wf_ref, bf_ref, wwh_ref, ww1_ref, bw_ref, out_ref):
    b_blk, tina, de = e_ref.shape          # (B_BLK, TI*n_a, 30)
    na = h_all_ref.shape[1]
    hd = h_all_ref.shape[2]
    ti = tina // na
    rows_e = b_blk * tina                  # edge rows fed to the MXU
    rows_n = b_blk * ti                    # node rows fed to the MXU

    # ---- filter_net: SELU(e @ Wf + bf) * edge_mask -------------------------
    # e / Wf are bf16 (dominant HBM traffic); accumulate in f32 on the MXU.
    e2 = e_ref[...].reshape(rows_e, de)                       # leading-dim merge
    ef = jnp.dot(e2, wf_ref[...], preferred_element_type=jnp.float32)
    ef = _selu(ef + bf_ref[...]) * em_ref[...].reshape(rows_e, 1)

    # ---- h1[b, i, f] = sum_j h[b, j, f] * ef[b, i, j, f] --------------------
    ef4 = ef.reshape(b_blk, ti, na, hd)
    h_all = h_all_ref[...]                                    # (B_BLK, n_a, H) f32
    h1 = jnp.sum(ef4 * h_all[:, None, :, :], axis=2)          # (B_BLK, TI, H)

    # ---- w: SELU([h, h1] @ Ww + bw) * node_mask, + residual ----------------
    # Ww is pre-split in the wrapper -> two K=H dots, no in-kernel concat/slice.
    hi = h_i_ref[...]                                         # (B_BLK, TI, H) f32
    z = (jnp.dot(hi.reshape(rows_n, hd), wwh_ref[...],
                 preferred_element_type=jnp.float32)
         + jnp.dot(h1.reshape(rows_n, hd), ww1_ref[...],
                   preferred_element_type=jnp.float32)
         + bw_ref[...])
    z = _selu(z) * nm_ref[...].reshape(rows_n, 1)
    out_ref[...] = (z.reshape(b_blk, ti, hd) + hi).astype(out_ref.dtype)


def _divisors_desc(n):
    return [d for d in range(n, 0, -1) if n % d == 0]


def _pick_tiles(nb, na, hd, de):
    """Choose (b_blk, ti) so the double-buffered working set stays well under a
    v7x-safe VMEM budget while keeping >= 2 grid steps when possible."""
    budget = 16 * 1024 * 1024

    def est_bytes(b_blk, ti):
        e_t = b_blk * ti * na * de * 2                 # bf16 edge tile
        em_t = b_blk * ti * na * 4
        h_t = b_blk * na * hd * 4 + b_blk * ti * hd * 4
        nm_t = b_blk * ti * 4
        o_t = b_blk * ti * hd * 4
        w = de * hd * 2 + 2 * hd * hd * 4 + 2 * hd * 4
        ef = b_blk * ti * na * hd * 4                  # f32 filter activation
        return 2 * (e_t + em_t + h_t + nm_t + o_t) + ef + w

    # i-tile candidates keep the (8,128) rule: full n_a, or 8-aligned divisors.
    ti_cands = [na] + [d for d in _divisors_desc(na) if d % 8 == 0 and d != na]
    # batch-block candidates: amortize per-step overhead, but leave >= 2 grid
    # steps when n_b > 1 so both v7x TensorCores get work.
    b_cands = [d for d in _divisors_desc(nb) if nb // d >= 2] or [nb]

    for b_blk in b_cands:
        for ti in ti_cands:
            if est_bytes(b_blk, ti) <= budget:
                return b_blk, ti
    return 1, ti_cands[-1]


def efconv(h, e, node_mask, edge_mask, wf, bf, ww, bw, *, b_blk=None, ti=None):
    nb, na, hd = h.shape
    de = e.shape[-1]
    if b_blk is None or ti is None:
        b_blk, ti = _pick_tiles(nb, na, hd, de)

    # ---- wrapper-side layout plumbing (free) --------------------------------
    e_flat = e.reshape(nb, na * na, de).astype(jnp.bfloat16)   # dominant traffic
    em_flat = edge_mask.reshape(nb, na * na, 1).astype(jnp.float32)
    nm = node_mask.astype(jnp.float32)
    wf_b = wf.astype(jnp.bfloat16)
    bf2 = bf.reshape(1, hd).astype(jnp.float32)
    ww_h = ww[:hd, :].astype(jnp.float32)                      # pre-split Ww
    ww_h1 = ww[hd:, :].astype(jnp.float32)
    bw2 = bw.reshape(1, hd).astype(jnp.float32)

    grid = (nb // b_blk, na // ti)
    grid_spec = pltpu.PrefetchScalarGridSpec(
        num_scalar_prefetch=0,
        grid=grid,
        in_specs=[
            pl.BlockSpec((b_blk, na, hd), lambda b, i: (b, 0, 0)),       # h (all j)
            pl.BlockSpec((b_blk, ti, hd), lambda b, i: (b, i, 0)),       # h (i-tile)
            pl.BlockSpec((b_blk, ti * na, de), lambda b, i: (b, i, 0)),  # e (bf16)
            pl.BlockSpec((b_blk, ti, 1), lambda b, i: (b, i, 0)),        # node_mask
            pl.BlockSpec((b_blk, ti * na, 1), lambda b, i: (b, i, 0)),   # edge_mask
            pl.BlockSpec((de, hd), lambda b, i: (0, 0)),                 # Wf (bf16)
            pl.BlockSpec((1, hd), lambda b, i: (0, 0)),                  # bf
            pl.BlockSpec((hd, hd), lambda b, i: (0, 0)),                 # Ww[:H]
            pl.BlockSpec((hd, hd), lambda b, i: (0, 0)),                 # Ww[H:]
            pl.BlockSpec((1, hd), lambda b, i: (0, 0)),                  # bw
        ],
        out_specs=pl.BlockSpec((b_blk, ti, hd), lambda b, i: (b, i, 0)),
    )
    return pl.pallas_call(
        _efconv_kernel,
        out_shape=jax.ShapeDtypeStruct((nb, na, hd), h.dtype),
        grid_spec=grid_spec,
        compiler_params=pltpu.CompilerParams(
            dimension_semantics=("parallel", "parallel"),
            vmem_limit_bytes=_VMEM_LIMIT_BYTES,
        ),
    )(h, h, e_flat, nm, em_flat, wf_b, bf2, ww_h, ww_h1, bw2)


def efconv_ref(h, e, node_mask, edge_mask, wf, bf, ww, bw):
    """Pure-JAX f32 reference mirroring the PyTorch forward."""
    ef = _selu(e @ wf + bf) * edge_mask
    h1 = jnp.sum(h[:, None, :, :] * ef, axis=-2)
    z = _selu(jnp.concatenate([h, h1], axis=-1) @ ww + bw) * node_mask
    return z + h


if __name__ == "__main__":
    # Small, deterministic shapes consistent with the module.
    n_b, n_a, hidden_dim, edge_dim = 2, 8, 32, 30

    key = jax.random.PRNGKey(0)
    k = jax.random.split(key, 8)

    h = jax.random.normal(k[0], (n_b, n_a, hidden_dim), jnp.float32)
    e = jax.random.normal(k[1], (n_b, n_a, n_a, edge_dim), jnp.float32)
    node_mask = jax.random.bernoulli(k[2], 0.8, (n_b, n_a, 1)).astype(jnp.float32)
    edge_mask = jax.random.bernoulli(k[3], 0.8, (n_b, n_a, n_a, 1)).astype(jnp.float32)

    # Parameters stored as (in, out) so forward is x @ W + b.
    wf = 0.1 * jax.random.normal(k[4], (edge_dim, hidden_dim), jnp.float32)
    bf = 0.1 * jax.random.normal(k[5], (hidden_dim,), jnp.float32)
    ww = 0.1 * jax.random.normal(k[6], (2 * hidden_dim, hidden_dim), jnp.float32)
    bw = 0.1 * jax.random.normal(k[7], (hidden_dim,), jnp.float32)

    out = efconv(h, e, node_mask, edge_mask, wf, bf, ww, bw)
    out = jax.block_until_ready(out)

    ref = efconv_ref(h, e, node_mask, edge_mask, wf, bf, ww, bw)
    assert out.shape == (n_b, n_a, hidden_dim)
    # Tolerance accounts for the bf16 cast of the edge tensor / filter weight
    # (f32 MXU accumulation); everything downstream is f32.
    assert jnp.allclose(out, ref, rtol=1e-2, atol=2e-2), "mismatch vs JAX reference"

    print("KERNEL_OK")
</pallas_src>

<mosaic_0001>
module attributes {stable_mosaic.version = 11 : i64} {
  func.func @_efconv_kernel(%arg0: i32, %arg1: i32, %arg2: memref<1x8x32xf32, #tpu.memory_space<vmem>>, %arg3: memref<1x8x32xf32, #tpu.memory_space<vmem>>, %arg4: memref<1x64x30xbf16, #tpu.memory_space<vmem>>, %arg5: memref<1x8x1xf32, #tpu.memory_space<vmem>>, %arg6: memref<1x64x1xf32, #tpu.memory_space<vmem>>, %arg7: memref<30x32xbf16, #tpu.memory_space<vmem>>, %arg8: memref<1x32xf32, #tpu.memory_space<vmem>>, %arg9: memref<32x32xf32, #tpu.memory_space<vmem>>, %arg10: memref<32x32xf32, #tpu.memory_space<vmem>>, %arg11: memref<1x32xf32, #tpu.memory_space<vmem>>, %arg12: memref<1x8x32xf32, #tpu.memory_space<vmem>>) attributes {dimension_semantics = [#tpu.dimension_semantics<parallel>, #tpu.dimension_semantics<parallel>], iteration_bounds = array<i64: 2, 1>, scalar_prefetch = 0 : i64, scratch_operands = 0 : i64, tpu.core_type = #tpu.core_type<tc>, window_params = [{transform_indices = @transform_0, window_bounds = array<i64: 1, 8, 32>}, {transform_indices = @transform_1, window_bounds = array<i64: 1, 8, 32>}, {transform_indices = @transform_2, window_bounds = array<i64: 1, 64, 30>}, {transform_indices = @transform_3, window_bounds = array<i64: 1, 8, 1>}, {transform_indices = @transform_4, window_bounds = array<i64: 1, 64, 1>}, {pipeline_mode = #tpu.pipeline_mode<synchronous>, transform_indices = @transform_5, window_bounds = array<i64: 30, 32>}, {pipeline_mode = #tpu.pipeline_mode<synchronous>, transform_indices = @transform_6, window_bounds = array<i64: 1, 32>}, {pipeline_mode = #tpu.pipeline_mode<synchronous>, transform_indices = @transform_7, window_bounds = array<i64: 32, 32>}, {pipeline_mode = #tpu.pipeline_mode<synchronous>, transform_indices = @transform_8, window_bounds = array<i64: 32, 32>}, {pipeline_mode = #tpu.pipeline_mode<synchronous>, transform_indices = @transform_9, window_bounds = array<i64: 1, 32>}, {transform_indices = @transform_10, window_bounds = array<i64: 1, 8, 32>}]} {
    %c0 = arith.constant 0 : index
    %c0_0 = arith.constant 0 : index
    %c0_1 = arith.constant 0 : index
    %0 = vector.load %arg4[%c0, %c0_0, %c0_1] : memref<1x64x30xbf16, #tpu.memory_space<vmem>>, vector<1x64x30xbf16>
    %1 = vector.shape_cast %0 : vector<1x64x30xbf16> to vector<64x30xbf16>
    %c0_2 = arith.constant 0 : index
    %c0_3 = arith.constant 0 : index
    %2 = vector.load %arg7[%c0_2, %c0_3] : memref<30x32xbf16, #tpu.memory_space<vmem>>, vector<30x32xbf16>
    %cst = arith.constant dense<0.000000e+00> : vector<64x32xf32>
    %3 = tpu.matmul %1, %2, %cst {dimension_numbers = #tpu.dot_dimension_numbers<[1], [0], [0], [1], [0, 0, 1, 1], [], []>} : vector<64x30xbf16>, vector<30x32xbf16>, vector<64x32xf32> -> vector<64x32xf32>
    %c0_4 = arith.constant 0 : index
    %c0_5 = arith.constant 0 : index
    %4 = vector.load %arg8[%c0_4, %c0_5] : memref<1x32xf32, #tpu.memory_space<vmem>>, vector<1x32xf32>
    %5 = vector.broadcast %4 : vector<1x32xf32> to vector<64x32xf32>
    %6 = arith.addf %3, %5 : vector<64x32xf32>
    %cst_6 = arith.constant 0.000000e+00 : f32
    %7 = vector.broadcast %cst_6 : f32 to vector<64x32xf32>
    %8 = arith.cmpf ogt, %6, %7 : vector<64x32xf32>
    %9 = math.exp %6 : vector<64x32xf32>
    %cst_7 = arith.constant 1.000000e+00 : f32
    %10 = vector.broadcast %cst_7 : f32 to vector<64x32xf32>
    %11 = arith.subf %9, %10 : vector<64x32xf32>
    %cst_8 = arith.constant 1.67326319 : f32
    %12 = vector.broadcast %cst_8 : f32 to vector<64x32xf32>
    %13 = arith.mulf %12, %11 : vector<64x32xf32>
    %14 = arith.select %8, %6, %13 : vector<64x32xi1>, vector<64x32xf32>
    %cst_9 = arith.constant 1.05070102 : f32
    %15 = vector.broadcast %cst_9 : f32 to vector<64x32xf32>
    %16 = arith.mulf %15, %14 : vector<64x32xf32>
    %c0_10 = arith.constant 0 : index
    %c0_11 = arith.constant 0 : index
    %c0_12 = arith.constant 0 : index
    %17 = vector.load %arg6[%c0_10, %c0_11, %c0_12] : memref<1x64x1xf32, #tpu.memory_space<vmem>>, vector<1x64x1xf32>
    %18 = vector.shape_cast %17 : vector<1x64x1xf32> to vector<64x1xf32>
    %19 = vector.broadcast %18 : vector<64x1xf32> to vector<64x32xf32>
    %20 = arith.mulf %16, %19 : vector<64x32xf32>
    %21 = vector.shape_cast %20 : vector<64x32xf32> to vector<1x8x8x32xf32>
    %c0_13 = arith.constant 0 : index
    %c0_14 = arith.constant 0 : index
    %c0_15 = arith.constant 0 : index
    %22 = vector.load %arg2[%c0_13, %c0_14, %c0_15] : memref<1x8x32xf32, #tpu.memory_space<vmem>>, vector<1x8x32xf32>
    %23 = vector.shape_cast %22 : vector<1x8x32xf32> to vector<1x1x8x32xf32>
    %24 = vector.broadcast %23 : vector<1x1x8x32xf32> to vector<1x8x8x32xf32>
    %25 = arith.mulf %21, %24 : vector<1x8x8x32xf32>
    %cst_16 = arith.constant dense<0.000000e+00> : vector<1x8x32xf32>
    %26 = vector.multi_reduction <add>, %25, %cst_16 [2] : vector<1x8x8x32xf32> to vector<1x8x32xf32>
    %c0_17 = arith.constant 0 : index
    %c0_18 = arith.constant 0 : index
    %c0_19 = arith.constant 0 : index
    %27 = vector.load %arg3[%c0_17, %c0_18, %c0_19] : memref<1x8x32xf32, #tpu.memory_space<vmem>>, vector<1x8x32xf32>
    %28 = vector.shape_cast %27 : vector<1x8x32xf32> to vector<8x32xf32>
    %c0_20 = arith.constant 0 : index
    %c0_21 = arith.constant 0 : index
    %29 = vector.load %arg9[%c0_20, %c0_21] : memref<32x32xf32, #tpu.memory_space<vmem>>, vector<32x32xf32>
    %cst_22 = arith.constant dense<0.000000e+00> : vector<8x32xf32>
    %30 = tpu.matmul %28, %29, %cst_22 {dimension_numbers = #tpu.dot_dimension_numbers<[1], [0], [0], [1], [0, 0, 1, 1], [], []>} : vector<8x32xf32>, vector<32x32xf32>, vector<8x32xf32> -> vector<8x32xf32>
    %31 = vector.shape_cast %26 : vector<1x8x32xf32> to vector<8x32xf32>
    %c0_23 = arith.constant 0 : index
    %c0_24 = arith.constant 0 : index
    %32 = vector.load %arg10[%c0_23, %c0_24] : memref<32x32xf32, #tpu.memory_space<vmem>>, vector<32x32xf32>
    %cst_25 = arith.constant dense<0.000000e+00> : vector<8x32xf32>
    %33 = tpu.matmul %31, %32, %cst_25 {dimension_numbers = #tpu.dot_dimension_numbers<[1], [0], [0], [1], [0, 0, 1, 1], [], []>} : vector<8x32xf32>, vector<32x32xf32>, vector<8x32xf32> -> vector<8x32xf32>
    %34 = arith.addf %30, %33 : vector<8x32xf32>
    %c0_26 = arith.constant 0 : index
    %c0_27 = arith.constant 0 : index
    %35 = vector.load %arg11[%c0_26, %c0_27] : memref<1x32xf32, #tpu.memory_space<vmem>>, vector<1x32xf32>
    %36 = vector.broadcast %35 : vector<1x32xf32> to vector<8x32xf32>
    %37 = arith.addf %34, %36 : vector<8x32xf32>
    %cst_28 = arith.constant 0.000000e+00 : f32
    %38 = vector.broadcast %cst_28 : f32 to vector<8x32xf32>
    %39 = arith.cmpf ogt, %37, %38 : vector<8x32xf32>
    %40 = math.exp %37 : vector<8x32xf32>
    %cst_29 = arith.constant 1.000000e+00 : f32
    %41 = vector.broadcast %cst_29 : f32 to vector<8x32xf32>
    %42 = arith.subf %40, %41 : vector<8x32xf32>
    %cst_30 = arith.constant 1.67326319 : f32
    %43 = vector.broadcast %cst_30 : f32 to vector<8x32xf32>
    %44 = arith.mulf %43, %42 : vector<8x32xf32>
    %45 = arith.select %39, %37, %44 : vector<8x32xi1>, vector<8x32xf32>
    %cst_31 = arith.constant 1.05070102 : f32
    %46 = vector.broadcast %cst_31 : f32 to vector<8x32xf32>
    %47 = arith.mulf %46, %45 : vector<8x32xf32>
    %c0_32 = arith.constant 0 : index
    %c0_33 = arith.constant 0 : index
    %c0_34 = arith.constant 0 : index
    %48 = vector.load %arg5[%c0_32, %c0_33, %c0_34] : memref<1x8x1xf32, #tpu.memory_space<vmem>>, vector<1x8x1xf32>
    %49 = vector.shape_cast %48 : vector<1x8x1xf32> to vector<8x1xf32>
    %50 = vector.broadcast %49 : vector<8x1xf32> to vector<8x32xf32>
    %51 = arith.mulf %47, %50 : vector<8x32xf32>
    %52 = vector.shape_cast %51 : vector<8x32xf32> to vector<1x8x32xf32>
    %53 = arith.addf %52, %27 : vector<1x8x32xf32>
    %c0_35 = arith.constant 0 : index
    %c0_36 = arith.constant 0 : index
    %c0_37 = arith.constant 0 : index
    %54 = vector.load %arg12[%c0_35, %c0_36, %c0_37] : memref<1x8x32xf32, #tpu.memory_space<vmem>>, vector<1x8x32xf32>
    tpu.vector_store %arg12[%c0_35, %c0_36, %c0_37], %53 {strides = array<i32>} : memref<1x8x32xf32, #tpu.memory_space<vmem>>, vector<1x8x32xf32>,
    return
  }
  func.func @transform_0(%arg0: i32, %arg1: i32) -> (i32, i32, i32) {
    %c0_i32 = arith.constant 0 : i32
    %c0_i32_0 = arith.constant 0 : i32
    %c0_i32_1 = arith.constant 0 : i32
    return %arg0, %c0_i32, %c0_i32_0 : i32, i32, i32
  }
  func.func @transform_1(%arg0: i32, %arg1: i32) -> (i32, i32, i32) {
    %c0_i32 = arith.constant 0 : i32
    %c0_i32_0 = arith.constant 0 : i32
    return %arg0, %arg1, %c0_i32 : i32, i32, i32
  }
  func.func @transform_2(%arg0: i32, %arg1: i32) -> (i32, i32, i32) {
    %c0_i32 = arith.constant 0 : i32
    %c0_i32_0 = arith.constant 0 : i32
    return %arg0, %arg1, %c0_i32 : i32, i32, i32
  }
  func.func @transform_3(%arg0: i32, %arg1: i32) -> (i32, i32, i32) {
    %c0_i32 = arith.constant 0 : i32
    %c0_i32_0 = arith.constant 0 : i32
    return %arg0, %arg1, %c0_i32 : i32, i32, i32
  }
  func.func @transform_4(%arg0: i32, %arg1: i32) -> (i32, i32, i32) {
    %c0_i32 = arith.constant 0 : i32
    %c0_i32_0 = arith.constant 0 : i32
    return %arg0, %arg1, %c0_i32 : i32, i32, i32
  }
  func.func @transform_5(%arg0: i32, %arg1: i32) -> (i32, i32) {
    %c0_i32 = arith.constant 0 : i32
    %c0_i32_0 = arith.constant 0 : i32
    %c0_i32_1 = arith.constant 0 : i32
    return %c0_i32, %c0_i32_0 : i32, i32
  }
  func.func @transform_6(%arg0: i32, %arg1: i32) -> (i32, i32) {
    %c0_i32 = arith.constant 0 : i32
    %c0_i32_0 = arith.constant 0 : i32
    %c0_i32_1 = arith.constant 0 : i32
    return %c0_i32, %c0_i32_0 : i32, i32
  }
  func.func @transform_7(%arg0: i32, %arg1: i32) -> (i32, i32) {
    %c0_i32 = arith.constant 0 : i32
    %c0_i32_0 = arith.constant 0 : i32
    %c0_i32_1 = arith.constant 0 : i32
    return %c0_i32, %c0_i32_0 : i32, i32
  }
  func.func @transform_8(%arg0: i32, %arg1: i32) -> (i32, i32) {
    %c0_i32 = arith.constant 0 : i32
    %c0_i32_0 = arith.constant 0 : i32
    %c0_i32_1 = arith.constant 0 : i32
    return %c0_i32, %c0_i32_0 : i32, i32
  }
  func.func @transform_9(%arg0: i32, %arg1: i32) -> (i32, i32) {
    %c0_i32 = arith.constant 0 : i32
    %c0_i32_0 = arith.constant 0 : i32
    %c0_i32_1 = arith.constant 0 : i32
    return %c0_i32, %c0_i32_0 : i32, i32
  }
  func.func @transform_10(%arg0: i32, %arg1: i32) -> (i32, i32, i32) {
    %c0_i32 = arith.constant 0 : i32
    %c0_i32_0 = arith.constant 0 : i32
    return %arg0, %arg1, %c0_i32 : i32, i32, i32
  }
}

</mosaic_0001>

<bundles_post_ra>
// kernel: tpu_custom_call.1
= control target key start
LH: loop header
LB: loop body
LE: loop exit
PB: predicated region body
PF: predicated region fallthrough
CT: control target
= control target key end

     0   :  { %s1713_s0 = inlined_call_operand.vmem [shape: f32[2,8,32], index: 0, kind: input, shape index: {}]   ;;  %s1714_s1 = inlined_call_operand.vmem [shape: f32[2,8,32], index: 1, kind: input, shape index: {}]   ;;  %s1715_s2 = inlined_call_operand.vmem [shape: bf16[2,64,30], index: 2, kind: input, shape index: {}]   ;;  %s1716_s3 = inlined_call_operand.vmem [shape: f32[2,8,1], index: 3, kind: input, shape index: {}]   ;;  %s1717_s4 = inlined_call_operand.vmem [shape: f32[2,64,1], index: 4, kind: input, shape index: {}]   ;;  %s1718_s5 = inlined_call_operand.vmem [shape: bf16[30,32], index: 5, kind: input, shape index: {}]   ;;  %s1719_s6 = inlined_call_operand.vmem [shape: f32[1,32], index: 6, kind: input, shape index: {}]   ;;  %s1720_s7 = inlined_call_operand.vmem [shape: f32[32,32], index: 7, kind: input, shape index: {}]   ;;  %s1721_s8 = inlined_call_operand.vmem [shape: f32[32,32], index: 8, kind: input, shape index: {}]   ;;  %s1722_s9 = inlined_call_operand.vmem [shape: f32[1,32], index: 9, kind: input, shape index: {}]   ;;  %s1723_s10 = inlined_call_operand.hbm [shape: f32[2,8,32], index: 10, kind: output, shape index: {}]  }
   0x1   :  { %1724 = sst [smem:[#allocation5_spill]] %s1713_s0 }
   0x2   :  { %15 = vsyncpa [#allocation3], 0 }
   0x3   :  { %17 = vsyncpa [#allocation3 + $0x1], 0  ;;  %s1487_s13 = smov 0   ;;  %s1489_s14 = smov 0  }
   0x4   :  { %s1491_s15 = smov 0   ;;  %s1493_s16 = smov 0  }
   0x5   :  { %s1495_s17 = smov 0   ;;  %s1497_s18 = smov 0  }
   0x6 LB: > { %s1157_s19 = sadd.s32 4294967295, %s1425_s18   ;;  %s1158_s20 = sadd.s32 4294967294, %s1425_s18   ;;  %s1425_s18 = sphi %s1497_s18, %s23_s18   ;;  %s1421_s17 = sphi %s1495_s17, %s1732_s17   ;;  %s1417_s16 = sphi %s1493_s16, %s1731_s16   ;;  %s1413_s15 = sphi %s1491_s15, %s1730_s15   ;;  %s1409_s14 = sphi %s1489_s14, %s1729_s14   ;;  %s1405_s13 = sphi %s1487_s13, %s1728_s13  }
   0x7   : > { %s35_s21 = sadd.s32 1, %s1421_s17  ;;  %s287_s22 = sadd.s32 1, %s1413_s15 }
   0x8   : > { %p37_p0 = scmp.ge.s32.totalorder %s35_s21, 2  ;;  %p297_p1 = scmp.ne.s32.totalorder %s1413_s15, %s1409_s14 }
   0x9   : > { %p298_p2 = scmp.eq.s32.totalorder %s1157_s19, 1  ;;  %p303_p3 = scmp.ne.s32.totalorder %s1409_s14, %s1405_s13 }
   0xa   : > { %s1734_s21 = smov (%p37_p0, %s35_s21), 0  ;;  %p304_p5 = scmp.eq.s32.totalorder %s1158_s20, 1 }
   0xb   : > { %p1527_p4 = por %p298_p2, %p297_p1  ;;  %s282_s24 = ssub.s32 %s1421_s17, %s1734_s21 }
   0xc   : > { %p1161_p6 = scmp.ge.s32.totalorder %s1425_s18, 1  ;;  %p285_p7 = scmp.eq.s32.totalorder %s282_s24, 0 }
   0xd   : > { %p1534_p8 = por %p304_p5, %p303_p3  ;;  %p390_p9 = scmp.lt.s32.totalorder %s1425_s18, 3 }
   0xe   : > { %s1540_s26 = scalar_select %p285_p7, %s1413_s15, %s287_s22  }
   0xf   : > { %p391_p10 = pnand %p1161_p6, %p390_p9 }
  0x10   : > { %v1323_v0 = vld [vmem:[%s1718_s5] sm:$0xff] (!%p391_p10)   ;;  %vm561_vm0 = vcmask (!%p391_p10), 1046528   ;;  %v1324_v1 = vld [vmem:[%s1718_s5 + $0x8] sm:$0x7f] (!%p391_p10)   ;;  %p459_p11 = scmp.lt.s32.totalorder (!%p391_p10), %s1417_s16, 1  ;;  %v1427_v2 = vmov (!%p391_p10), 0  }
  0x11   : > { %394 = sbr.rel (%p391_p10) target bundleno = 561 (0x231), region = 60  ;;  %1215 = vmatprep.subr.bf16.mxu0 (!%p391_p10), %v1323_v0  ;;  %1321 = vset.pattern.permute.xlu0 (!%p391_p10), %v1427_v2  ;;  %v563_v3 = vsel (!%p391_p10), %vm561_vm0, %v1324_v1, 0  ;;  %vm548_vm1 = vcmask (!%p391_p10), 244736   ;;  %v813_v17 = vld [vmem:[%s1721_s8] sm:$0xff] (!%p391_p10)  ;;  %v814_v18 = vld [vmem:[%s1721_s8 + $0x8] sm:$0xff] (!%p391_p10)  ;;  %v1428_v20 = vmov (!%p391_p10), 0.0|0.0  }
  0x12   : > { %1216 = vmatpush3.bf16.msra.mxu0 (!%p391_p10), %v1323_v0  ;;  %1322 = vset.pattern.permute.xlu1 (!%p391_p10), %v1427_v2  ;;  %v1250_v19 = vpack.c.bf16 (!%p391_p10), %v814_v18, %v813_v17  ;;  %v815_v21 = vld [vmem:[%s1721_s8 + $0x10] sm:$0xff] (!%p391_p10)  ;;  %v816_v22 = vld [vmem:[%s1721_s8 + $0x18] sm:$0xff] (!%p391_p10)  ;;  %vm1429_vm2 = vmmov (!%p391_p10), 0   ;;  %v1430_v24 = vmov (!%p391_p10), 0.0   ;;  %v1170_v25 = vld [vmem:[%s1719_s6] ss:$0 sm:$0xff] (!%p391_p10) }
  0x13   : > { %1261 = vmatprep.subr.msk.bf16.mxu0 (!%p391_p10), %vm561_vm0, %v1324_v1  ;;  %1249 = vmatprep.subr.bf16.mxu1 (!%p391_p10), %v1428_v20  ;;  %v1253_v23 = vpack.c.bf16 (!%p391_p10), %v816_v22, %v815_v21  ;;  %s1727_s0 = sld [smem:[#allocation5_spill]] (!%p391_p10)  ;;  %vm751_vm6 = vcmask (!%p391_p10), 261120   ;;  %vm825_vm12 = vcmask (!%p391_p10), 1041409   ;;  %vm827_vm13 = vcmask (!%p391_p10), 1042434   ;;  %s1194_s22 = sshll.u32 (!%p391_p10), %s1417_s16, 7 }
  0x14   : > { %1251 = vmatpush3.bf16.msra.mxu1 (!%p391_p10), %v1250_v19  ;;  %1235 = vmatprep.mubr.msk.f32.mxu1 (!%p391_p10), %vm1429_vm2, %v1430_v24  ;;  %vm829_vm14 = vcmask (!%p391_p10), 1043459   ;;  %vm831_vm15 = vcmask (!%p391_p10), 1044484   ;;  %vm833_vm0 = vcmask (!%p391_p10), 1045509  }
  0x15   : > { %1252 = vmatprep.subr.bf16.mxu1 (!%p391_p10), %v1428_v20 }
  0x16   : > { %1218 = vmatpush3.bf16.msra.mxu0 (!%p391_p10), %v563_v3 }
  0x18   : > { %s460_s11 = scalar_select %p459_p11, %s1417_s16, 1  ;;  %1254 = vmatpush3.bf16.msra.mxu1 %v1253_v23 }
  0x19   : > { %1255 = vmatprep.subr.bf16.mxu1 %v1428_v20  ;;  %s1431_s16 = smov [#allocation2]  }
  0x1a   : > { %s1197_s12 = sshll.u32 %s460_s11, 5  ;;  %s1198_s19 = sshll.u32 %s460_s11, 6 }
  0x1b   : > { %s478_s24 = scalar_lea.vmem %s1715_s2, %s1197_s12  ;;  %s495_s29 = scalar_lea.vmem %s1717_s4, %s1198_s19 }
  0x1c   : > { %v1325_v4 = vld [vmem:[%s478_s24] sm:$0xff]   ;;  %v1326_v5 = vld [vmem:[%s478_s24 + $0x8] sm:$0xff]   ;;  %v1327_v6 = vld [vmem:[%s478_s24 + $0x10] sm:$0xff]   ;;  %s1560_s30 = sshll.u32 %s460_s11, 3 }
  0x1d   : > { %1219 = vmatprep.mubr.msk.bf16.mxu0 %vm548_vm1, %v1325_v4  ;;  %v686_v7 = vld [vmem:[%s495_s29] sm:$0xff]  ;;  %v688_v8 = vld [vmem:[%s495_s29 + $0x10] sm:$0xff]  ;;  %v687_v9 = vld [vmem:[%s495_s29 + $0x8] sm:$0xff]  ;;  %s486_s20 = scalar_lea.vmem %s1716_s3, %s1560_s30  ;;  %s462_s11 = scalar_lea.vmem %s1727_s0, %s1560_s30 }
  0x1e   : > { %1220 = vmatmul.mubr.msk.bf16.vlgmr.msra.gmra.mrb[0].mxu0 %vm548_vm1, %v1326_v5  ;;  %696 = vperm.xlu0 %1321, %v686_v7   ;;  %v689_v10 = vld [vmem:[%s495_s29 + $0x18] sm:$0xff]  ;;  %v690_v12 = vld [vmem:[%s495_s29 + $0x20] sm:$0xff]  ;;  %v691_v13 = vld [vmem:[%s495_s29 + $0x28] sm:$0xff] }
  0x1f   : > { %1223 = vmatprep.mubr.msk.bf16.mxu0 %vm548_vm1, %v1327_v6  ;;  %706 = vperm.xlu1 %1322, %v688_v8   ;;  %v1328_v11 = vld [vmem:[%s478_s24 + $0x18] sm:$0xff]   ;;  %v692_v14 = vld [vmem:[%s495_s29 + $0x30] sm:$0xff]  ;;  %v999_v16 = vld [vmem:[%s486_s20] sm:$0xff]  ;;  %s456_s20 = sand.u32 1, %s1409_s14  }
  0x20   : > { %v693_v15 = vld [vmem:[%s495_s29 + $0x38] sm:$0xff]  ;;  %v1602_v4 = vld [vmem:[%s462_s11] sm:$0xff]  ;;  %s469_s29 = scalar_lea.vmem %s1714_s1, %s1560_s30  ;;  %s1162_s30 = sshll.u32 %s456_s20, 3 }
  0x21   : > { %s458_s24 = scalar_lea.vmem [#allocation2], %s1162_s30  ;;  %s1009_s12 = scalar_lea.sflag [#allocation3], %s456_s20 }
  0x22   : > { %701 = vperm.xlu0 %1321, %v687_v9   ;;  %s1023_s27 = sshll.u32 %s458_s24, 4  ;;  %s1351_s30 = sshll.u32 %s1431_s16, 4  ;;  %s1667_s27 = int_to_ptr.vmem [resolvable:$true] %s1023_s27  ;;  %s1352_s30 = int_to_ptr.vmem [resolvable:$false] %s1351_s30 }
  0x23   : > { %711 = vperm.xlu1 %1322, %v689_v10   ;;  %s1347_s19 = scalar_lea.vmem %s1667_s27, 128  ;;  %s1353_s0 = scalar_lea.vmem %s1352_s30, 256 }
  0x24   : > { %p1348_p12 = scmp.ne.s32.totalorder %s1667_s27, %s1347_s19  ;;  %p1354_p1 = scmp.lt.s32.totalorder %s1667_s27, %s1352_s30 }
  0x25   : > { %p1355_p2 = scmp.lt.s32.totalorder %s1353_s0, %s1347_s19 }
  0x26   : > { %1224 = vmatmul.mubr.msk.bf16.gmra.mrb[4].mxu0 %vm548_vm1, %v1328_v11  ;;  %716 = vperm.xlu0 %1321, %v690_v12   ;;  %vm835_vm1 = vcmask 1046534   ;;  %p1349_p13 = pnand %p1348_p12, %p1527_p4 }
  0x27   : > { %721 = vperm.xlu1 %1322, %v691_v13   ;;  %p1356_p3 = por %p1355_p2, %p1354_p1 }
  0x28   : > { %p1350_p0 = pneg %p1349_p13 }
  0x2a   : > { %726 = vperm.xlu0 %1321, %v692_v14   ;;  %p1357_p5 = pnand %p1356_p3, %p1350_p0 }
  0x2b   : > { %731 = vperm.xlu1 %1322, %v693_v15  }
  0x2e   : > { %1002 = vperm.xlu0 %1321, %v999_v16  }
  0x9d   : > { %v697_v46 = vpop.permute.xlu0 %696 }
  0x9e   : > { %v707_v58 = vpop.permute.xlu1 %706 }
  0xa1   : > { %v702_v57 = vpop.permute.xlu0 %701 }
  0xa2   : > { %v712_v15 = vpop.permute.xlu1 %711 }
  0xa5   : > { %v717_v14 = vpop.permute.xlu0 %716 }
  0xf1   : > { %v1221_v26 = vpop.f32.mrb[0].mxu0 }
  0xf2   : > { %v608_v27 = vadd.f32 %v1221_v26, %v1170_v25  ;;  %v599_v28 = vpop.f32.mrb[1].mxu0 }
  0xf3   : > { %v600_v29 = vadd.f32 %v1170_v25, %v599_v28  ;;  %v1222_v30 = vpop.f32.mrb[2].mxu0 }
  0xf4   : > { %v642_v31 = vmul.f32 1.442695, %v608_v27  ;;  %v611_v32 = vadd.f32 %v1222_v30, %v1170_v25  ;;  %v602_v33 = vpop.f32.mrb[3].mxu0  ;;  %vm632_vm3 = vcmp.gt.f32.partialorder %v608_v27, 0.0 }
  0xf5   : > { %v638_v34 = vmul.f32 1.442695, %v600_v29  ;;  %v603_v35 = vadd.f32 %v1170_v25, %v602_v33  ;;  %vm630_vm4 = vcmp.gt.f32.partialorder %v600_v29, 0.0 }
  0xf6   : > { %1329 = vpow2.f32 %v642_v31  ;;  %v644_v36 = vmul.f32 1.442695, %v611_v32  ;;  %vm633_vm5 = vcmp.gt.f32.partialorder %v611_v32, 0.0 }
  0xf7   : > { %1331 = vpow2.f32 %v638_v34  ;;  %v640_v37 = vmul.f32 1.442695, %v603_v35  ;;  %vm631_vm7 = vcmp.gt.f32.partialorder %v603_v35, 0.0 }
  0xf8   : > { %1333 = vpow2.f32 %v644_v36 }
  0xf9   : > { %1335 = vpow2.f32 %v640_v37  ;;  %v1225_v38 = vpop.f32.mrb[4].mxu0 }
  0xfa   : > { %v1586_v39 = vadd.f32 %v1225_v38, %v1170_v25  ;;  %v615_v40 = vpop.f32.mrb[5].mxu0 }
  0xfb   : > { %v1588_v41 = vadd.f32 %v1170_v25, %v615_v40  ;;  %v1226_v42 = vpop.f32.mrb[6].mxu0 }
  0xfc   : > { %v650_v43 = vmul.f32 1.442695, %v1586_v39  ;;  %v1591_v44 = vadd.f32 %v1226_v42, %v1170_v25  ;;  %v618_v45 = vpop.f32.mrb[7].mxu0  ;;  %vm636_vm8 = vcmp.gt.f32.partialorder %v1586_v39, 0.0 }
  0xfd   : > { %v646_v47 = vmul.f32 1.442695, %v1588_v41  ;;  %v1594_v48 = vadd.f32 %v1170_v25, %v618_v45  ;;  %vm634_vm9 = vcmp.gt.f32.partialorder %v1588_v41, 0.0 }
  0xfe   : > { %1337 = vpow2.f32 %v650_v43  ;;  %v652_v49 = vmul.f32 1.442695, %v1591_v44  ;;  %vm637_vm11 = vcmp.gt.f32.partialorder %v1591_v44, 0.0 }
  0xff   : > { %1339 = vpow2.f32 %v646_v47  ;;  %v648_v50 = vmul.f32 1.442695, %v1594_v48  ;;  %vm635_vm10 = vcmp.gt.f32.partialorder %v1594_v48, 0.0  ;;  %v727_v47 = vpop.permute.xlu0 %726 }
 0x100   : > { %v1330_v51 = vpop.eup %1329  ;;  %1341 = vpow2.f32 %v652_v49 }
 0x101   : > { %v1332_v52 = vpop.eup %1331  ;;  %v1183_v53 = vadd.f32 -1.0, %v1330_v51  ;;  %1343 = vpow2.f32 %v648_v50 }
 0x102   : > { %v1334_v54 = vpop.eup %1333  ;;  %v1181_v55 = vadd.f32 -1.0, %v1332_v52 }
 0x103   : > { %v1336_v56 = vpop.eup %1335  ;;  %v664_v59 = vmul.f32 1.6732632, %v1183_v53  ;;  %v1184_v60 = vadd.f32 -1.0, %v1334_v54 }
 0x104   : > { %v662_v61 = vmul.f32 1.6732632, %v1181_v55  ;;  %v1182_v62 = vadd.f32 -1.0, %v1336_v56 }
 0x105   : > { %v672_v63 = vsel %vm632_vm3, %v608_v27, %v664_v59  ;;  %v665_v0 = vmul.f32 1.6732632, %v1184_v60  ;;  %vm837_vm3 = vcmask 1047559  }
 0x106   : > { %v670_v1 = vsel %vm630_vm4, %v600_v29, %v662_v61  ;;  %v663_v2 = vmul.f32 1.6732632, %v1182_v62  ;;  %v680_v3 = vmul.f32 1.050701, %v672_v63 }
 0x107   : > { %v678_v5 = vmul.f32 1.050701, %v670_v1  ;;  %v673_v6 = vsel %vm633_vm5, %v611_v32, %v665_v0 }
 0x108   : > { %v1338_v7 = vpop.eup %1337  ;;  %v671_v8 = vsel %vm631_vm7, %v603_v35, %v663_v2  ;;  %v736_v9 = vmul.f32 %v707_v58, %v680_v3  ;;  %v681_v10 = vmul.f32 1.050701, %v673_v6  ;;  %v722_v58 = vpop.permute.xlu1 %721 }
 0x109   : > { %v1340_v11 = vpop.eup %1339  ;;  %v734_v12 = vmul.f32 %v697_v46, %v678_v5  ;;  %v679_v13 = vmul.f32 1.050701, %v671_v8  ;;  %v1187_v16 = vadd.f32 -1.0, %v1338_v7 }
 0x10a   : > { %v1342_v17 = vpop.eup %1341  ;;  %v745_v18 = vmul.f32 %v1602_v4, %v736_v9  ;;  %v1185_v19 = vadd.f32 -1.0, %v1340_v11  ;;  %v737_v21 = vmul.f32 %v712_v15, %v681_v10 }
 0x10b   : > { %v1344_v22 = vpop.eup %1343  ;;  %v743_v23 = vmul.f32 %v1602_v4, %v734_v12  ;;  %v735_v25 = vmul.f32 %v702_v57, %v679_v13  ;;  %v668_v26 = vmul.f32 1.6732632, %v1187_v16  ;;  %v1188_v27 = vadd.f32 -1.0, %v1342_v17 }
 0x10c   : > { %v766_v28 = vsel %vm751_vm6, %v745_v18, 0.0  ;;  %v666_v29 = vmul.f32 1.6732632, %v1185_v19  ;;  %v746_v30 = vmul.f32 %v1602_v4, %v737_v21  ;;  %v1186_v31 = vadd.f32 -1.0, %v1344_v22  ;;  %v732_v18 = vpop.permute.xlu1 %731 }
 0x10d   : > { %v752_v32 = vsel %vm751_vm6, %v743_v23, 0.0  ;;  %v744_v33 = vmul.f32 %v1602_v4, %v735_v25  ;;  %v767_v34 = vrot.slane %v766_v28, 4  ;;  %v676_v35 = vsel %vm636_vm8, %v1586_v39, %v668_v26 }
 0x10e   : > { %v753_v36 = vrot.slane %v752_v32, 4  ;;  %v674_v37 = vsel %vm634_vm9, %v1588_v41, %v666_v29  ;;  %v773_v38 = vsel %vm751_vm6, %v746_v30, 0.0  ;;  %v684_v40 = vmul.f32 1.050701, %v676_v35 }
 0x10f   : > { %v759_v42 = vsel %vm751_vm6, %v744_v33, 0.0  ;;  %v768_v43 = vadd.f32 %v767_v34, %v766_v28  ;;  %v682_v45 = vmul.f32 1.050701, %v674_v37  ;;  %v774_v46 = vrot.slane %v773_v38, 4 }
 0x110   : > { %v754_v49 = vadd.f32 %v753_v36, %v752_v32  ;;  %v760_v50 = vrot.slane %v759_v42, 4  ;;  %v740_v51 = vmul.f32 %v727_v47, %v684_v40  ;;  %v667_v52 = vmul.f32 1.6732632, %v1186_v31 }
 0x111   : > { %v769_v53 = vrot.slane %v768_v43, 2  ;;  %v738_v39 = vmul.f32 %v717_v14, %v682_v45  ;;  %v775_v54 = vadd.f32 %v774_v46, %v773_v38  ;;  %v669_v55 = vmul.f32 1.6732632, %v1188_v27 }
 0x112   : > { %v755_v56 = vrot.slane %v754_v49, 2  ;;  %v761_v57 = vadd.f32 %v760_v50, %v759_v42  ;;  %v749_v41 = vmul.f32 %v1602_v4, %v740_v51  ;;  %v675_v59 = vsel %vm635_vm10, %v1594_v48, %v667_v52  ;;  %v809_v52 = vld [vmem:[%s1720_s7] sm:$0xff] }
 0x113   : > { %v770_v60 = vadd.f32 %v769_v53, %v768_v43  ;;  %v747_v61 = vmul.f32 %v1602_v4, %v738_v39  ;;  %v776_v62 = vrot.slane %v775_v54, 2  ;;  %v683_v63 = vmul.f32 1.050701, %v675_v59  ;;  %v810_v53 = vld [vmem:[%s1720_s7 + $0x8] sm:$0xff]  ;;  %v812_v59 = vld [vmem:[%s1720_s7 + $0x18] sm:$0xff] }
 0x114   : > { %v756_v0 = vadd.f32 %v755_v56, %v754_v49  ;;  %v762_v1 = vrot.slane %v761_v57, 2  ;;  %v794_v2 = vsel %vm751_vm6, %v749_v41, 0.0  ;;  %v677_v3 = vsel %vm637_vm11, %v1591_v44, %v669_v55 }
 0x115   : > { %v780_v5 = vsel %vm751_vm6, %v747_v61, 0.0  ;;  %v777_v6 = vadd.f32 %v776_v62, %v775_v54  ;;  %v795_v7 = vrot.slane %v794_v2, 4  ;;  %v739_v10 = vmul.f32 %v722_v58, %v683_v63  ;;  %v811_v58 = vld [vmem:[%s1720_s7 + $0x10] sm:$0xff]  ;;  %v808_v62 = vld [vmem:[%s469_s29] sm:$0xff]  ;;  %s1665_s29 = scalar_lea.hbm %s1723_s10, %s1194_s22 }
 0x116   : > { %v757_v8 = vrot.slane %v756_v0, 1  ;;  %v763_v9 = vadd.f32 %v762_v1, %v761_v57  ;;  %v781_v48 = vrot.slane %v780_v5, 4  ;;  %v771_v11 = vrot.slane %v770_v60, 1 }
 0x117   : > { %v796_v12 = vadd.f32 %v795_v7, %v794_v2  ;;  %v685_v13 = vmul.f32 1.050701, %v677_v3  ;;  %v778_v16 = vrot.slane %v777_v6, 1  ;;  %v748_v17 = vmul.f32 %v1602_v4, %v739_v10  ;;  %v1191_v2 = vld [vmem:[%s1722_s9] ss:$0 sm:$0xff]  ;;  %v1003_v10 = vpop.permute.xlu0 %1002 }
 0x118   : > { %v764_v14 = vrot.slane %v763_v9, 1  ;;  %v782_v15 = vadd.f32 %v781_v48, %v780_v5  ;;  %v758_v19 = vadd.f32 %v757_v8, %v756_v0  ;;  %v772_v26 = vadd.f32 %v771_v11, %v770_v60 }
 0x119   : > { %v741_v44 = vmul.f32 %v732_v18, %v685_v13  ;;  %v797_v23 = vrot.slane %v796_v12, 2  ;;  %v787_v25 = vsel %vm751_vm6, %v748_v17, 0.0  ;;  %v779_v31 = vadd.f32 %v778_v16, %v777_v6 }
 0x11a   : > { %v765_v21 = vadd.f32 %v764_v14, %v763_v9  ;;  %v783_v22 = vrot.slane %v782_v15, 2  ;;  %v788_v27 = vrot.slane %v787_v25, 4  ;;  %v1256_v41 = vpack.c.bf16 %v810_v53, %v809_v52 }
 0x11b   : > { %v750_v28 = vmul.f32 %v1602_v4, %v741_v44  ;;  %v798_v36 = vadd.f32 %v797_v23, %v796_v12  ;;  %v1259_v61 = vpack.c.bf16 %v812_v59, %v811_v58 }
 0x11c   : > { %v826_v29 = vsel %vm825_vm12, %v765_v21, %v758_v19  ;;  %v784_v30 = vadd.f32 %v783_v22, %v782_v15  ;;  %v789_v33 = vadd.f32 %v788_v27, %v787_v25 }
 0x11d   : > { %v828_v32 = vsel %vm827_vm13, %v772_v26, %v826_v29  ;;  %v801_v34 = vsel %vm751_vm6, %v750_v28, 0.0  ;;  %v799_v46 = vrot.slane %v798_v36, 1 }
 0x11e   : > { %v785_v35 = vrot.slane %v784_v30, 1  ;;  %v802_v37 = vrot.slane %v801_v34, 4  ;;  %v830_v38 = vsel %vm829_vm14, %v779_v31, %v828_v32  ;;  %v790_v40 = vrot.slane %v789_v33, 2 }
 0x11f   : > { %v800_v39 = vadd.f32 %v799_v46, %v798_v36 }
 0x120   : > { %v786_v42 = vadd.f32 %v785_v35, %v784_v30  ;;  %v803_v43 = vadd.f32 %v802_v37, %v801_v34  ;;  %v791_v45 = vadd.f32 %v790_v40, %v789_v33 }
 0x122   : > { %v804_v47 = vrot.slane %v803_v43, 2  ;;  %v832_v4 = vsel %vm831_vm15, %v786_v42, %v830_v38  ;;  %v792_v49 = vrot.slane %v791_v45, 1 }
 0x124   : > { %v805_v50 = vadd.f32 %v804_v47, %v803_v43  ;;  %v793_v51 = vadd.f32 %v792_v49, %v791_v45 }
 0x126   : > { %v806_v54 = vrot.slane %v805_v50, 1  ;;  %v834_v55 = vsel %vm833_vm0, %v793_v51, %v832_v4 }
 0x127   : > { %v836_v57 = vsel %vm835_vm1, %v800_v39, %v834_v55 }
 0x128   : > { %v807_v56 = vadd.f32 %v806_v54, %v805_v50 }
 0x12a   : > { %v838_v60 = vsel %vm837_vm3, %v807_v56, %v836_v57 }
 0x12b   : > { %1236 = vmatmul.mubr.msk.f32.vlgmr.msra.gmra.mrb[0].mxu1 %vm751_vm6, %v838_v60 }
 0x12c   : > { %1257 = vmatpush3.bf16.msra.mxu1 %v1256_v41  ;;  %1246 = vmatprep.mubr.msk.f32.mxu1 %vm1429_vm2, %v1430_v24 }
 0x12d   : > { %1258 = vmatprep.subr.bf16.mxu1 %v1428_v20 }
 0x130   : > { %1260 = vmatpush3.bf16.msra.mxu1 %v1259_v61 }
 0x133   : > { %1247 = vmatmul.mubr.msk.f32.vlgmr.msra.gmra.mrb[2].mxu1 %vm751_vm6, %v808_v62 }
 0x1fe   : > { %v907_v63 = vpop.f32.mrb[0].mxu1 }
 0x1ff   : > { %v1237_v0 = vpop.f32.mrb[1].mxu1 }
 0x206   : > { %v980_v1 = vpop.f32.mrb[2].mxu1 }
 0x207   : > { %v981_v3 = vadd.f32 %v980_v1, %v907_v63  ;;  %v1248_v24 = vpop.f32.mrb[3].mxu1 }
 0x209   : > { %v991_v5 = vadd.f32 %v1191_v2, %v981_v3 }
 0x20b   : > { %v993_v20 = vmul.f32 1.442695, %v991_v5  ;;  %vm992_vm2 = vcmp.gt.f32.partialorder %v991_v5, 0.0 }
 0x20d   : > { %1345 = vpow2.f32 %v993_v20 }
 0x217   : > { %v1346_v6 = vpop.eup %1345 }
 0x218   : > { %v1192_v7 = vadd.f32 -1.0, %v1346_v6 }
 0x21a   : > { %v996_v8 = vmul.f32 1.6732632, %v1192_v7 }
 0x21c   : > { %v997_v9 = vsel %vm992_vm2, %v991_v5, %v996_v8 }
 0x21d   : > { %v998_v48 = vmul.f32 1.050701, %v997_v9 }
 0x21f   : > { %v1005_v11 = vmul.f32 %v1003_v10, %v998_v48 }
 0x221   : > { %v1006_v12 = vadd.f32 %v1005_v11, %v808_v62 }
 0x223   : > { %1007 = vst.msk [vmem:[%s458_s24] sm:$0xff] %vm751_vm6, %v1006_v12 }
 0x224   : > { %1360 = shalt.err (!%p1357_p5)
}
 0x225   : > { %s1361_s20 = scalar_lea.hbm %s1665_s29, 128  ;;  %s1365_s11 = scalar_lea.hbm %s1723_s10, 256 }
 0x226   : > { %p1362_p6 = scmp.ne.s32.totalorder %s1665_s29, %s1361_s20  ;;  %p1366_p10 = scmp.lt.u32.totalorder %s1665_s29, %s1723_s10 }
 0x227   : > { %p1367_p11 = scmp.lt.u32.totalorder %s1365_s11, %s1361_s20  ;;  %p1369_p13 = scmp.lt.u32.totalorder %s1361_s20, %s1665_s29 }
 0x228   : > { %p1363_p7 = pnand %p1362_p6, %p1527_p4 }
 0x229   : > { %p1368_p12 = por %p1367_p11, %p1366_p10 }
 0x22a   : > { %p1364_p9 = pneg %p1363_p7 }
 0x22b   : > { %p1370_p0 = por %p1369_p13, %p1368_p12 }
 0x22d   : > { %p1371_p1 = pnand %p1370_p0, %p1364_p9 }
 0x22f   : > { %1374 = shalt.err (!%p1371_p1)
}
 0x230   : > { %1262 = dma.vmem_to_hbm [thread:$0]  (%p1527_p4), %s1667_s27, 128, %s1665_s29, %s1009_s12  }
 0x231 PF: > { %p1268_p2 = scmp.ge.s32.totalorder %s1425_s18, 2  ;;  %s1035_s0 = sand.u32 1, %s1405_s13  }
 0x232   : > { %s1036_s19 = scalar_lea.sflag [#allocation3], %s1035_s0 }
 0x233   : > { %p1265_p3 = pnand %p1268_p2, %p1534_p8 }
 0x235   : > { %1400 = dma.done.wait (!%p1265_p3), %s1036_s19, 128  }
 0x236   : > { %1402 = vsyncadd (!%p1265_p3), %s1036_s19, 4294967168  ;;  %s23_s18 = sadd.s32 1, %s1425_s18   ;;  %s1728_s13 = smov %s1409_s14 }
 0x237   : > { %p20_p5 = scmp.ge.s32.totalorder %s23_s18, 4   ;;  %s1729_s14 = smov %s1413_s15 }
 0x238   : > { %s1730_s15 = smov %s1540_s26  ;;  %s1731_s16 = smov %s1421_s17 }
 0x239   : > { %s1732_s17 = smov %s1734_s21  ;;  %22 = sbr.rel (!%p20_p5) target bundleno = 6 (0x6), region = 107 }
 0x240   :  { %1041 = vsyncpa [#allocation3], 1 }
 0x241   :  { %1043 = vsyncpa [#allocation3 + $0x1], 1 }

</bundles_post_ra>
